<compile_context>
chip_gen: v5e
topology: v5e:2x2
jax: 0.10.0
libtpu: 0.0.40
codegen_flags: <defaults>
</compile_context>

<pallas_src>
import math

import jax
import jax.numpy as jnp
from jax.experimental import pallas as pl
from jax.experimental.pallas import tpu as pltpu


_VMEM_BUDGET_BYTES = 44 * 1024 * 1024   # estimate budget (v7x-safe)
_VMEM_LIMIT_CAP = 48 * 1024 * 1024      # compiler-param cap (v7x has 64 MiB/TC)


def _round_up(v, m):
    return ((v + m - 1) // m) * m


def _cdiv(a, b):
    return -(-a // b)


def _pick_tm(m, target, min_tiles=1, align=8):
    """Adaptive M tile: minimize padding waste while keeping (8)-alignment."""
    m_al = _round_up(max(m, 1), align)
    n_tiles = max(_cdiv(m_al, target), min_tiles)
    n_tiles = max(1, min(n_tiles, m_al // align))
    return _round_up(_cdiv(m_al, n_tiles), align)


def _pick_divisor_tile(dim_p, target):
    """Largest multiple of 128 that is <= target and divides dim_p (dim_p % 128 == 0)."""
    t = min(_round_up(target, 128), dim_p)
    while dim_p % t != 0:
        t -= 128
    return t


# ----------------------------- kernels --------------------------------------

def _dense_resident_kernel(x_ref, w_ref, b_ref, o_ref):
    # x_ref: (tm, Kp) activation tile
    # w_ref: (Kp, Np) full padded weight in [K, N] layout -- constant block
    #        index, so it is DMA'd HBM->VMEM only once for the whole grid.
    # b_ref: (1,  Np) bias
    # o_ref: (tm, Np) output tile
    acc = jnp.dot(x_ref[...], w_ref[...], preferred_element_type=jnp.float32)
    o_ref[...] = (acc + b_ref[...].astype(jnp.float32)).astype(o_ref.dtype)


def _dense_tiled_kernel(x_ref, w_ref, b_ref, o_ref, acc_ref):
    # x_ref: (tm, tk); w_ref: (tk, tn) native [K, N] layout; b_ref: (1, tn)
    # o_ref: (tm, tn); acc_ref: (tm, tn) f32 accumulator resident across k.
    k = pl.program_id(2)

    @pl.when(k == 0)
    def _init():
        acc_ref[...] = jnp.zeros_like(acc_ref)

    acc_ref[...] += jnp.dot(x_ref[...], w_ref[...],
                            preferred_element_type=jnp.float32)

    @pl.when(k == pl.num_programs(2) - 1)
    def _finalize():
        o_ref[...] = (acc_ref[...] + b_ref[...].astype(jnp.float32)).astype(o_ref.dtype)


# ------------------------- parameter preparation ----------------------------

def prepare_dense_params(weight, bias, *, compute_dtype=None):
    """One-time prep, hoisted out of the per-call path.

    weight: [output_dim, input_dim] (PyTorch Linear layout)
    bias:   [output_dim]
    Returns a dict with the weight transposed to MXU-native [K, N] layout and
    both weight/bias zero-padded to 128-aligned K/N.
    """
    out_dim, in_dim = weight.shape
    k_p = _round_up(in_dim, 128)
    n_p = _round_up(out_dim, 128)

    w_kn = weight.T                                   # [in_dim, out_dim]
    if compute_dtype is not None:
        w_kn = w_kn.astype(compute_dtype)
    if (k_p, n_p) != (in_dim, out_dim):
        w_kn = jnp.pad(w_kn, ((0, k_p - in_dim), (0, n_p - out_dim)))

    b = bias.reshape(1, out_dim).astype(jnp.float32)  # bias kept in f32
    if n_p != out_dim:
        b = jnp.pad(b, ((0, 0), (0, n_p - out_dim)))

    return {"w_kn": w_kn, "b": b, "in_dim": in_dim, "out_dim": out_dim}


# ------------------------------- forward ------------------------------------

def dense_apply(x, params, *, max_resident_weight_bytes=8 * 1024 * 1024,
                compute_dtype=None):
    """y = x @ W^T + b using the prepared params. x: [..., input_dim]."""
    w_kn = params["w_kn"]
    b_p = params["b"]
    in_dim = params["in_dim"]
    out_dim = params["out_dim"]

    orig_shape = x.shape
    assert orig_shape[-1] == in_dim, (orig_shape, in_dim)
    out_dtype = x.dtype
    if compute_dtype is not None:
        x = x.astype(compute_dtype)

    x2 = x.reshape(-1, in_dim)
    m = x2.shape[0]
    k_p, n_p = w_kn.shape

    x_item = jnp.dtype(x2.dtype).itemsize
    w_item = jnp.dtype(w_kn.dtype).itemsize
    o_item = jnp.dtype(out_dtype).itemsize
    weight_bytes = k_p * n_p * w_item

    resident = weight_bytes <= max_resident_weight_bytes

    if resident:
        # ---------------- weight-resident fast path (1-D grid over M) -------
        # Expose >=2 M blocks when possible so v7x's 2 TensorCores both work.
        min_tiles = 2 if _round_up(m, 8) >= 16 else 1
        tm = _pick_tm(m, target=512, min_tiles=min_tiles)

        def vmem_est(tm_):
            return (2 * tm_ * k_p * x_item       # double-buffered x tile
                    + 2 * k_p * n_p * w_item     # weight buffers (copied once)
                    + 2 * n_p * 4                # bias
                    + 2 * tm_ * n_p * o_item)    # double-buffered out tile

        for _ in range(16):
            if vmem_est(tm) <= _VMEM_BUDGET_BYTES or tm <= 8:
                break
            tm = max(8, _round_up(tm // 2, 8))

        m_p = _round_up(m, tm)
        x_p = x2
        if (m_p, k_p) != (m, in_dim):
            x_p = jnp.pad(x2, ((0, m_p - m), (0, k_p - in_dim)))

        grid = (m_p // tm,)
        cost = pl.CostEstimate(
            flops=2 * m_p * k_p * n_p,
            transcendentals=0,
            bytes_accessed=(m_p * k_p * x_item + k_p * n_p * w_item
                            + n_p * 4 + m_p * n_p * o_item),
        )
        vmem_limit = int(min(_VMEM_LIMIT_CAP,
                             max(int(vmem_est(tm) * 1.2), 16 * 1024 * 1024)))

        out_p = pl.pallas_call(
            _dense_resident_kernel,
            out_shape=jax.ShapeDtypeStruct((m_p, n_p), out_dtype),
            grid_spec=pltpu.PrefetchScalarGridSpec(
                num_scalar_prefetch=0,
                grid=grid,
                in_specs=[
                    pl.BlockSpec((tm, k_p), lambda i: (i, 0)),
                    pl.BlockSpec((k_p, n_p), lambda i: (0, 0)),   # resident
                    pl.BlockSpec((1, n_p), lambda i: (0, 0)),
                ],
                out_specs=pl.BlockSpec((tm, n_p), lambda i: (i, 0)),
            ),
            compiler_params=pltpu.CompilerParams(
                dimension_semantics=("parallel",),
                vmem_limit_bytes=vmem_limit,
            ),
            cost_estimate=cost,
        )(x_p, w_kn, b_p)

    else:
        # ---------------- K-split tiled path (large weights) ----------------
        tn = _pick_divisor_tile(n_p, 512)
        tk = _pick_divisor_tile(k_p, 512)
        grid_n = n_p // tn
        min_tiles = 2 if (grid_n == 1 and _round_up(m, 8) >= 16) else 1
        tm = _pick_tm(m, target=512, min_tiles=min_tiles)

        def vmem_est(tm_, tn_, tk_):
            return (2 * tm_ * tk_ * x_item + 2 * tk_ * tn_ * w_item
                    + 2 * tn_ * 4 + 2 * tm_ * tn_ * o_item + tm_ * tn_ * 4)

        for _ in range(16):
            if vmem_est(tm, tn, tk) <= _VMEM_BUDGET_BYTES:
                break
            if tk > 128:
                tk = _pick_divisor_tile(k_p, max(128, (tk // 2) // 128 * 128))
            elif tn > 128:
                tn = _pick_divisor_tile(n_p, max(128, (tn // 2) // 128 * 128))
            elif tm > 8:
                tm = max(8, _round_up(tm // 2, 8))
            else:
                break

        m_p = _round_up(m, tm)
        x_p = x2
        if (m_p, k_p) != (m, in_dim):
            x_p = jnp.pad(x2, ((0, m_p - m), (0, k_p - in_dim)))

        grid = (m_p // tm, n_p // tn, k_p // tk)
        # Actual streamed traffic: x re-read (N/tn)x, W re-read (M/tm)x.
        cost = pl.CostEstimate(
            flops=2 * m_p * k_p * n_p,
            transcendentals=0,
            bytes_accessed=(m_p * k_p * x_item * grid[1]
                            + k_p * n_p * w_item * grid[0]
                            + n_p * 4 * grid[0]
                            + m_p * n_p * o_item),
        )
        vmem_limit = int(min(_VMEM_LIMIT_CAP,
                             max(int(vmem_est(tm, tn, tk) * 1.25),
                                 16 * 1024 * 1024)))

        out_p = pl.pallas_call(
            _dense_tiled_kernel,
            out_shape=jax.ShapeDtypeStruct((m_p, n_p), out_dtype),
            grid_spec=pltpu.PrefetchScalarGridSpec(
                num_scalar_prefetch=0,
                grid=grid,
                in_specs=[
                    pl.BlockSpec((tm, tk), lambda i, j, k: (i, k)),
                    pl.BlockSpec((tk, tn), lambda i, j, k: (k, j)),
                    pl.BlockSpec((1, tn), lambda i, j, k: (0, j)),
                ],
                out_specs=pl.BlockSpec((tm, tn), lambda i, j, k: (i, j)),
                scratch_shapes=[pltpu.VMEM((tm, tn), jnp.float32)],
            ),
            compiler_params=pltpu.CompilerParams(
                dimension_semantics=("parallel", "parallel", "arbitrary"),
                vmem_limit_bytes=vmem_limit,
            ),
            cost_estimate=cost,
        )(x_p, w_kn, b_p)

    out = out_p[:m, :out_dim]
    return out.reshape(orig_shape[:-1] + (out_dim,))


def dense_forward(x, weight, bias, **kwargs):
    """Convenience one-shot API (nn.Linear semantics). In a model, call
    prepare_dense_params once and reuse the result across forward passes."""
    return dense_apply(x, prepare_dense_params(weight, bias), **kwargs)


def init_dense_params(key, input_dim, output_dim, dtype=jnp.float32):
    """Deterministic init mimicking nn.Linear's default (uniform +/- 1/sqrt(in))."""
    k_w, k_b = jax.random.split(key)
    bound = 1.0 / math.sqrt(input_dim)
    weight = jax.random.uniform(
        k_w, (output_dim, input_dim), dtype=dtype, minval=-bound, maxval=bound
    )
    bias = jax.random.uniform(
        k_b, (output_dim,), dtype=dtype, minval=-bound, maxval=bound
    )
    return weight, bias


if __name__ == "__main__":
    key = jax.random.PRNGKey(0)
    k_x, k_par, k_x2, k_par2 = jax.random.split(key, 4)

    # Small shapes consistent with the module: [batch, seq, input_dim] -> output_dim.
    B, S, INPUT_DIM, OUTPUT_DIM = 2, 8, 32, 64
    x = jax.random.normal(k_x, (B, S, INPUT_DIM), dtype=jnp.float32)
    weight, bias = init_dense_params(k_par, INPUT_DIM, OUTPUT_DIM)

    params = prepare_dense_params(weight, bias)          # one-time transpose + pad
    out = jax.block_until_ready(dense_apply(x, params))  # weight-resident path
    ref = jnp.einsum("bsi,oi->bso", x, weight) + bias
    assert out.shape == (B, S, OUTPUT_DIM)
    assert jnp.allclose(out, ref, atol=1e-5, rtol=1e-5)

    # Ragged M + non-128-aligned K/N (adaptive tm, padding correctness).
    M2, K2, N2 = 300, 513, 200
    x2 = jax.random.normal(k_x2, (M2, K2), dtype=jnp.float32)
    w2, b2 = init_dense_params(k_par2, K2, N2)
    p2 = prepare_dense_params(w2, b2)
    out2 = jax.block_until_ready(dense_apply(x2, p2))
    ref2 = x2 @ w2.T + b2
    assert out2.shape == (M2, N2)
    assert jnp.allclose(out2, ref2, atol=1e-4, rtol=1e-4)

    # Force the K-split tiled path (multi-K grid + f32 accumulator) on the same data.
    out3 = jax.block_until_ready(
        dense_apply(x2, p2, max_resident_weight_bytes=0))
    assert jnp.allclose(out3, ref2, atol=1e-4, rtol=1e-4)

    print("KERNEL_OK")
</pallas_src>

<mosaic_0001>
module attributes {stable_mosaic.version = 11 : i64} {
  func.func @_dense_resident_kernel(%arg0: i32, %arg1: memref<8x128xf32, #tpu.memory_space<vmem>>, %arg2: memref<128x128xf32, #tpu.memory_space<vmem>>, %arg3: memref<1x128xf32, #tpu.memory_space<vmem>>, %arg4: memref<8x128xf32, #tpu.memory_space<vmem>>) attributes {dimension_semantics = [#tpu.dimension_semantics<parallel>], iteration_bounds = array<i64: 2>, scalar_prefetch = 0 : i64, scratch_operands = 0 : i64, tpu.core_type = #tpu.core_type<tc>, window_params = [{transform_indices = @transform_0, window_bounds = array<i64: 8, 128>}, {pipeline_mode = #tpu.pipeline_mode<synchronous>, transform_indices = @transform_1, window_bounds = array<i64: 128, 128>}, {pipeline_mode = #tpu.pipeline_mode<synchronous>, transform_indices = @transform_2, window_bounds = array<i64: 1, 128>}, {transform_indices = @transform_3, window_bounds = array<i64: 8, 128>}]} {
    %c0 = arith.constant 0 : index
    %c0_0 = arith.constant 0 : index
    %0 = vector.load %arg1[%c0, %c0_0] : memref<8x128xf32, #tpu.memory_space<vmem>>, vector<8x128xf32>
    %c0_1 = arith.constant 0 : index
    %c0_2 = arith.constant 0 : index
    %1 = vector.load %arg2[%c0_1, %c0_2] : memref<128x128xf32, #tpu.memory_space<vmem>>, vector<128x128xf32>
    %cst = arith.constant dense<0.000000e+00> : vector<8x128xf32>
    %2 = tpu.matmul %0, %1, %cst {dimension_numbers = #tpu.dot_dimension_numbers<[1], [0], [0], [1], [0, 0, 1, 1], [], []>} : vector<8x128xf32>, vector<128x128xf32>, vector<8x128xf32> -> vector<8x128xf32>
    %c0_3 = arith.constant 0 : index
    %c0_4 = arith.constant 0 : index
    %3 = vector.load %arg3[%c0_3, %c0_4] : memref<1x128xf32, #tpu.memory_space<vmem>>, vector<1x128xf32>
    %4 = vector.broadcast %3 : vector<1x128xf32> to vector<8x128xf32>
    %5 = arith.addf %2, %4 : vector<8x128xf32>
    %c0_5 = arith.constant 0 : index
    %c0_6 = arith.constant 0 : index
    %6 = vector.load %arg4[%c0_5, %c0_6] : memref<8x128xf32, #tpu.memory_space<vmem>>, vector<8x128xf32>
    tpu.vector_store %arg4[%c0_5, %c0_6], %5 {strides = array<i32>} : memref<8x128xf32, #tpu.memory_space<vmem>>, vector<8x128xf32>,
    return
  }
  func.func @transform_0(%arg0: i32) -> (i32, i32) {
    %c0_i32 = arith.constant 0 : i32
    %c0_i32_0 = arith.constant 0 : i32
    return %arg0, %c0_i32 : i32, i32
  }
  func.func @transform_1(%arg0: i32) -> (i32, i32) {
    %c0_i32 = arith.constant 0 : i32
    %c0_i32_0 = arith.constant 0 : i32
    %c0_i32_1 = arith.constant 0 : i32
    return %c0_i32, %c0_i32_0 : i32, i32
  }
  func.func @transform_2(%arg0: i32) -> (i32, i32) {
    %c0_i32 = arith.constant 0 : i32
    %c0_i32_0 = arith.constant 0 : i32
    %c0_i32_1 = arith.constant 0 : i32
    return %c0_i32, %c0_i32_0 : i32, i32
  }
  func.func @transform_3(%arg0: i32) -> (i32, i32) {
    %c0_i32 = arith.constant 0 : i32
    %c0_i32_0 = arith.constant 0 : i32
    return %arg0, %c0_i32 : i32, i32
  }
}

</mosaic_0001>

<bundles_post_ra>
// kernel: tpu_custom_call.1
= control target key start
LH: loop header
LB: loop body
LE: loop exit
PB: predicated region body
PF: predicated region fallthrough
CT: control target
= control target key end

     0   :  { %8 = vsyncpa [#allocation3], 0  ;;  %s718_s0 = inlined_call_operand.hbm [shape: f32[16,128], index: 0, kind: input, shape index: {}]   ;;  %s719_s1 = inlined_call_operand.hbm [shape: f32[128,128], index: 1, kind: input, shape index: {}]   ;;  %s720_s2 = inlined_call_operand.vmem [shape: f32[1,128], index: 2, kind: input, shape index: {}]   ;;  %s721_s3 = inlined_call_operand.hbm [shape: f32[16,128], index: 3, kind: output, shape index: {}]  }
   0x1   :  { %10 = vsyncpa [#allocation3 + $0x1], 0 }
   0x2   :  { %11 = vsyncpa [#allocation6], 0 }
   0x3   :  { %12 = vsyncpa [#allocation4], 0 }
   0x4   :  { %14 = vsyncpa [#allocation4 + $0x1], 0  ;;  %s572_s12 = smov 0   ;;  %s574_s13 = smov 0  }
   0x5   :  { %s576_s14 = smov 0   ;;  %s578_s15 = smov 0  }
   0x6 LB: > { %s130_s18 = sshll.u32 %s719_s1, 4  ;;  %s596_s19 = sadd.s32 4294967295, %s547_s15   ;;  %s547_s15 = sphi %s578_s15, %s731_s15   ;;  %s543_s14 = sphi %s576_s14, %s730_s14   ;;  %s539_s13 = sphi %s574_s13, %s729_s13   ;;  %s535_s12 = sphi %s572_s12, %s728_s12   ;;  %s131_s18 = int_to_ptr.hbm [resolvable:$true] %s130_s18 }
   0x7   : > { %p344_p0 = scmp.ge.s32.totalorder %s547_s15, 1  ;;  %p41_p1 = scmp.eq.s32.totalorder %s596_s19, 0 }
   0x8   : > { %p119_p2 = scmp.lt.s32.totalorder %s547_s15, 3  ;;  %s549_s21 = smov [#allocation5]  }
   0x9   : > { %s132_s22 = sshll.u32 %s549_s21, 4  ;;  %s550_s23 = smov 128   ;;  %s133_s22 = int_to_ptr.vmem [resolvable:$true] %s132_s22 }
   0xa   : > { %p601_p3 = pnand %p344_p0, %p119_p2  ;;  %s551_s24 = smov 8  }
   0xb   : > { %s343_s25 = sadd.s32 4294967294, %s547_s15   ;;  %s612_s26 = sadd.s32 1, %s547_s15  }
   0xc   : > { %p365_p4 = pneg %p601_p3  ;;  %s27_s27 = sadd.s32 1, %s543_s14 }
   0xd   : > { %s24_s28 = ssub.s32 %s547_s15, %s612_s26  ;;  %p34_p7 = scmp.ne.s32.totalorder %s543_s14, %s539_s13 }
   0xe   : > { %p366_p6 = pnand %p365_p4, %p41_p1  ;;  %p25_p8 = scmp.eq.s32.totalorder %s24_s28, 0 }
   0xf   : > { %p35_p9 = scmp.eq.s32.totalorder %s547_s15, 0  ;;  %p40_p10 = scmp.ne.s32.totalorder %s539_s13, %s535_s12 }
  0x10   : > { %368 = dma.hbm_to_vmem [thread:$0]  (!%p366_p6), %s131_s18, 2048, %s133_s22, [#allocation6], %s550_s23, %s550_s23, %s551_s24  }
  0x11   : > { %p106_p11 = scmp.eq.s32.totalorder %s596_s19, 1  ;;  %p628_p12 = por %p41_p1, %p40_p10 }
  0x12   : > { %s624_s29 = scalar_select %p25_p8, %s543_s14, %s27_s27  }
  0x13   : > { %p632_p13 = por %p106_p11, %p34_p7  ;;  %p112_p0 = scmp.eq.s32.totalorder %s343_s25, 1 }
  0x14   : > { %p36_p2 = por %p35_p9, %p34_p7  ;;  %s149_s5 = sand.u32 1, %s543_s14  }
  0x15   : > { %p637_p4 = por %p112_p0, %p40_p10  ;;  %p378_p6 = scmp.lt.s32.totalorder %s547_s15, 2 }
  0x16   : > { %s347_s7 = sshll.u32 %s149_s5, 3  ;;  %s348_s8 = sshll.u32 %s547_s15, 3 }
  0x17   : > { %s157_s11 = scalar_lea.hbm %s718_s0, %s348_s8  ;;  %s153_s17 = scalar_lea.vmem [#allocation2], %s347_s7 }
  0x18   : > { %s159_s16 = sshll.u32 %s157_s11, 4  ;;  %s161_s18 = sshll.u32 %s153_s17, 4  ;;  %s160_s16 = int_to_ptr.hbm [resolvable:$true] %s159_s16  ;;  %s162_s18 = int_to_ptr.vmem [resolvable:$true] %s161_s18 }
  0x19   : > { %p646_p8 = pnand %p378_p6, %p36_p2  ;;  %s150_s22 = scalar_lea.sflag [#allocation3], %s149_s5 }
  0x1a   : > { %s447_s23 = sshra.s32 %s160_s16, 4  ;;  %s454_s28 = scalar_lea.hbm %s718_s0, 16  ;;  %s448_s23 = int_to_ptr.hbm [resolvable:$true] %s447_s23 }
  0x1b   : > { %s449_s24 = scalar_lea.hbm %s448_s23, 8  ;;  %p451_p9 = pneg %p646_p8 }
  0x1c   : > { %p450_p7 = scmp.ne.s32.totalorder %s448_s23, %s449_s24  ;;  %p455_p0 = scmp.lt.s32.totalorder %s448_s23, %s718_s0 }
  0x1d   : > { %p456_p2 = scmp.lt.s32.totalorder %s454_s28, %s449_s24 }
  0x1e   : > { %p452_p10 = pnand %p451_p9, %p450_p7 }
  0x1f   : > { %p457_p6 = por %p456_p2, %p455_p0 }
  0x20   : > { %p453_p11 = pneg %p452_p10 }
  0x22   : > { %p458_p5 = pnand %p457_p6, %p453_p11 }
  0x24   : > { %461 = shalt.err (!%p458_p5)
}
  0x25   : > { %372 = dma.hbm_to_vmem [thread:$0]  (!%p646_p8), %s160_s16, 128, %s162_s18, %s150_s22  }
  0x26   : > { %170 = sbr.rel (%p601_p3) target bundleno = 209 (0xd1), region = 32  ;;  %s663_s5 = sand.u32 (!%p601_p3), 1, %s539_s13  }
  0x27   : > { %s350_s9 = sshll.u32 (!%p601_p3), %s663_s5, 3  ;;  %s173_s10 = scalar_lea.sflag (!%p601_p3), [#allocation3], %s663_s5 }
  0x28   : > { %s669_s11 = scalar_lea.vmem (!%p601_p3), [#allocation2], %s350_s9 }
  0x2b   : > { %522 = dma.done.wait (%p628_p12), %s173_s10, 128  }
  0x2c   : > { %524 = vsyncadd (%p628_p12), %s173_s10, 4294967168 }
  0x2d   : > { %526 = dma.done.wait (%p41_p1), [#allocation6], 2048  }
  0x2e   : > { %528 = vsyncadd (%p41_p1), [#allocation6], 4294965248  ;;  %v221_v0 = vld [vmem:[#allocation5 + $0x78] sm:$0xff]  ;;  %v220_v1 = vld [vmem:[#allocation5 + $0x70] sm:$0xff]  ;;  %s354_s20 = sshll.u32 %s596_s19, 3  ;;  %s204_s22 = scalar_lea.vmem [#allocation7], %s350_s9 }
  0x2f   : > { %226 = vmatpush.msra.mxu0 %v221_v0  ;;  %v219_v2 = vld [vmem:[#allocation5 + $0x68] sm:$0xff]  ;;  %v218_v3 = vld [vmem:[#allocation5 + $0x60] sm:$0xff]  ;;  %v217_v4 = vld [vmem:[#allocation5 + $0x58] sm:$0xff]  ;;  %s258_s17 = scalar_lea.hbm %s721_s3, %s354_s20  ;;  %s260_s23 = sshll.u32 %s204_s22, 4  ;;  %s261_s23 = int_to_ptr.vmem [resolvable:$true] %s260_s23 }
  0x30   : > { %v216_v5 = vld [vmem:[#allocation5 + $0x50] sm:$0xff]  ;;  %v215_v6 = vld [vmem:[#allocation5 + $0x48] sm:$0xff]  ;;  %v214_v7 = vld [vmem:[#allocation5 + $0x40] sm:$0xff]  ;;  %s262_s24 = sshll.u32 %s258_s17, 4  ;;  %s248_s25 = scalar_lea.sflag [#allocation4], %s663_s5  ;;  %s263_s24 = int_to_ptr.hbm [resolvable:$true] %s262_s24 }
  0x31   : > { %227 = vmatpush.msra.mxu0 %v220_v1  ;;  %v213_v8 = vld [vmem:[#allocation5 + $0x38] sm:$0xff]  ;;  %v212_v9 = vld [vmem:[#allocation5 + $0x30] sm:$0xff]  ;;  %v211_v10 = vld [vmem:[#allocation5 + $0x28] sm:$0xff]  ;;  %s491_s19 = sshra.s32 %s263_s24, 4  ;;  %s497_s8 = scalar_lea.hbm %s721_s3, 16  ;;  %s492_s19 = int_to_ptr.hbm [resolvable:$true] %s491_s19 }
  0x32   : > { %v210_v11 = vld [vmem:[#allocation5 + $0x20] sm:$0xff]  ;;  %v209_v12 = vld [vmem:[#allocation5 + $0x18] sm:$0xff]  ;;  %v208_v13 = vld [vmem:[#allocation5 + $0x10] sm:$0xff]  ;;  %s493_s27 = scalar_lea.hbm %s492_s19, 8  ;;  %p498_p12 = scmp.lt.s32.totalorder %s492_s19, %s721_s3 }
  0x33   : > { %228 = vmatpush.msra.mxu0 %v219_v2  ;;  %v207_v14 = vld [vmem:[#allocation5 + $0x8] sm:$0xff]  ;;  %v206_v15 = vld [vmem:[#allocation5] sm:$0xff]  ;;  %v205_v16 = vld [vmem:[%s669_s11] sm:$0xff]  ;;  %p494_p1 = scmp.ne.s32.totalorder %s492_s19, %s493_s27  ;;  %p499_p8 = scmp.lt.s32.totalorder %s497_s8, %s493_s27 }
  0x34   : > { %v416_v17 = vld [vmem:[%s720_s2] ss:$0 sm:$0xff] }
  0x35   : > { %229 = vmatpush.msra.mxu0 %v218_v3  ;;  %p495_p3 = pnand %p494_p1, %p632_p13  ;;  %p500_p7 = por %p499_p8, %p498_p12 }
  0x37   : > { %230 = vmatpush.msra.mxu0 %v217_v4  ;;  %p496_p5 = pneg %p495_p3 }
  0x39   : > { %231 = vmatpush.msra.mxu0 %v216_v5  ;;  %p501_p9 = pnand %p500_p7, %p496_p5 }
  0x3b   : > { %232 = vmatpush.msra.mxu0 %v215_v6 }
  0x3d   : > { %233 = vmatpush.msra.mxu0 %v214_v7 }
  0x3f   : > { %234 = vmatpush.msra.mxu0 %v213_v8 }
  0x41   : > { %235 = vmatpush.msra.mxu0 %v212_v9 }
  0x43   : > { %236 = vmatpush.msra.mxu0 %v211_v10 }
  0x45   : > { %237 = vmatpush.msra.mxu0 %v210_v11 }
  0x47   : > { %238 = vmatpush.msra.mxu0 %v209_v12 }
  0x49   : > { %239 = vmatpush.msra.mxu0 %v208_v13 }
  0x4b   : > { %240 = vmatpush.msra.mxu0 %v207_v14 }
  0x4d   : > { %241 = vmatpush.msra.mxu0 %v206_v15 }
  0x4e   : > { %242 = vmatmul.f32.vlgmr.msra.gmra.mxu0 %v205_v16 }
  0xcb   : > { %v243_v18 = vpop.f32.mrf.mxu0 }
  0xcc   : > { %v244_v19 = vadd.f32 %v416_v17, %v243_v18 }
  0xce   : > { %246 = vst [vmem:[%s204_s22] sm:$0xff] %v244_v19 }
  0xcf   : > { %504 = shalt.err (!%p501_p9)
}
  0xd0   : > { %363 = dma.vmem_to_hbm [thread:$0]  (%p632_p13), %s261_s23, 128, %s263_s24, %s248_s25  }
  0xd1 PF: > { %s274_s5 = sand.u32 1, %s535_s12   ;;  %p727_p10 = scmp.ge.s32.totalorder %s547_s15, 2 }
  0xd2   : > { %s275_s11 = scalar_lea.sflag [#allocation4], %s274_s5 }
  0xd3   : > { %p374_p11 = pnand %p727_p10, %p637_p4 }
  0xd5   : > { %p375_p0 = pneg %p374_p11 }
  0xd7   : > { %530 = dma.done.wait (%p375_p0), %s275_s11, 128  }
  0xd8   : > { %532 = vsyncadd (%p375_p0), %s275_s11, 4294967168  ;;  %p17_p2 = scmp.ge.s32.totalorder %s612_s26, 4   ;;  %s728_s12 = smov %s539_s13 }
  0xd9   : > { %s729_s13 = smov %s543_s14  ;;  %s730_s14 = smov %s624_s29 }
  0xda   : > { %s731_s15 = smov %s612_s26  ;;  %19 = sbr.rel (!%p17_p2) target bundleno = 6 (0x6), region = 81 }
  0xdf   :  { %281 = vsyncpa [#allocation3], 1 }
  0xe0   :  { %283 = vsyncpa [#allocation3 + $0x1], 1 }
  0xe1   :  { %284 = vsyncpa [#allocation6], 1 }
  0xe2   :  { %285 = vsyncpa [#allocation4], 1 }
  0xe3   :  { %287 = vsyncpa [#allocation4 + $0x1], 1 }

</bundles_post_ra>
